<compile_context>
chip_gen: v7x
topology: tpu7x:2x2x1
jax: 0.10.0
libtpu: 0.0.40
codegen_flags: <defaults>
</compile_context>

<pallas_src>
import functools

import numpy as np
import jax
import jax.numpy as jnp
from jax import lax
from jax.experimental import pallas as pl
from jax.experimental.pallas import tpu as pltpu

BN_EPS = 1e-5

_TAPS = [(dh, dw) for dh in (-1, 0, 1) for dw in (-1, 0, 1)]  # kh*3 + kw order


# ---------------------------------------------------------------------------
# Fused Pallas kernel
# ---------------------------------------------------------------------------

def _bottleneck_kernel(x_ref, m9_ref, w1_ref, b1_ref, w2_ref, b2_ref,
                       w3_ref, b3_ref, o_ref, *, W):
    """Fused bottleneck for a block of B images.

    x_ref : (B, Cin, HW)  residual / conv1 input (channels on sublanes,
                          flattened spatial on lanes -> lane-dense)
    m9_ref: (9, HW)       f32 {0,1} halo masks, one row per 3x3 tap
    w1_ref: (P, Cin)      bf16 conv1 weight, BN1 scale folded in
    b1_ref: (P, 1)        f32 BN1 shift
    w2_ref: (P, 9P)       bf16 conv2 weight (tap-major, in-channel-minor K)
    b2_ref: (P, 1)        f32 BN2 shift
    w3_ref: (4P, P)       bf16 conv3 weight, BN3 scale folded in
    b3_ref: (4P, 1)       f32 BN3 shift
    o_ref : (B, 4P, HW)
    """
    B = x_ref.shape[0]
    HW = x_ref.shape[2]

    for b in range(B):  # small static unroll over the images in this block
        # ---- conv1 (1x1) + bn1 + relu ----------------------------------
        o1 = jnp.dot(w1_ref[...], x_ref[b].astype(jnp.bfloat16),
                     preferred_element_type=jnp.float32)
        o1 = jnp.maximum(o1 + b1_ref[...], 0.0)            # (P, HW) f32

        # ---- conv2 (3x3, stride 1, pad 1) + bn2 + relu -------------------
        # Build the 9 taps as lane rolls + precomputed halo masks, stack them
        # along sublanes, and do ONE K=9P matmul on the MXU.
        taps = []
        for t, (dh, dw) in enumerate(_TAPS):
            off = dh * W + dw                              # flat input offset
            if off == 0:
                p = o1                                     # center tap: no mask
            else:
                # shifted[pos] = o1[pos + off]; wrapped lanes zeroed by mask
                p = pltpu.roll(o1, (-off) % HW, 1)
                p = p * m9_ref[pl.ds(t, 1), :]             # (P,HW)*(1,HW)
            taps.append(p)
        patch = jnp.concatenate(taps, axis=0).astype(jnp.bfloat16)  # (9P, HW)
        o2 = jnp.dot(w2_ref[...], patch, preferred_element_type=jnp.float32)
        o2 = jnp.maximum(o2 + b2_ref[...], 0.0)            # (P, HW) f32

        # ---- conv3 (1x1) + bn3 + residual add + relu ---------------------
        o3 = jnp.dot(w3_ref[...], o2.astype(jnp.bfloat16),
                     preferred_element_type=jnp.float32)
        o3 = o3 + b3_ref[...] + x_ref[b]                   # residual read here
        o_ref[b] = jnp.maximum(o3, 0.0).astype(o_ref.dtype)


# ---------------------------------------------------------------------------
# Host-side helpers
# ---------------------------------------------------------------------------

def _make_tap_masks(H, W):
    """(9, H*W) f32 {0,1} masks: mask[t, pos]=1 iff tap t's source pixel for
    flattened output position `pos` is inside the image (3x3, SAME padding)."""
    HW = H * W
    pos = np.arange(HW)
    h = pos // W
    w = pos % W
    rows = []
    for dh, dw in _TAPS:
        ok = np.ones((HW,), bool)
        if dh == -1:
            ok &= h >= 1
        elif dh == 1:
            ok &= h <= H - 2
        if dw == -1:
            ok &= w >= 1
        elif dw == 1:
            ok &= w <= W - 2
        rows.append(ok)
    return jnp.asarray(np.stack(rows).astype(np.float32))


def _images_per_step(n):
    """v7x (and other multi-TensorCore parts) get >=2 parallel grid steps;
    single-TC chips (v5e/v6e) get one fat step to amortize per-step overhead."""
    try:
        kind = jax.devices()[0].device_kind.lower()
    except Exception:
        kind = ""
    multi_tc = any(s in kind for s in ("v7", "v4", "v5p"))
    if multi_tc and n % 2 == 0:
        return n // 2
    return n


@jax.jit
def bottleneck_forward(x_nchw, params):
    # NOTE: `tsm(x)` in the PyTorch forward is dead code (its result is
    # overwritten by conv1(x)), so it is intentionally not computed here.
    N, Cin, H, W = x_nchw.shape
    HW = H * W
    planes = params["w1"].shape[0]
    cout = params["w3"].shape[0]
    assert cout == Cin, "residual add requires inplanes == planes*4"

    x = x_nchw.reshape(N, Cin, HW)        # free reshape, keeps NCHW layout
    mask9 = _make_tap_masks(H, W)         # numpy constant, embedded once

    ips = _images_per_step(N)             # images per grid step
    grid = (N // ips,)

    kernel = functools.partial(_bottleneck_kernel, W=W)

    flops = 2 * (Cin * planes + 9 * planes * planes + planes * cout) * HW * N
    bytes_accessed = (
        (x.size + N * cout * HW) * 4
        + (params["w1"].size + params["w2"].size + params["w3"].size) * 2
        + (params["b1"].size + params["b2"].size + params["b3"].size
           + mask9.size) * 4
    )

    out = pl.pallas_call(
        kernel,
        out_shape=jax.ShapeDtypeStruct((N, cout, HW), x_nchw.dtype),
        grid=grid,
        in_specs=[
            pl.BlockSpec((ips, Cin, HW), lambda n: (n, 0, 0)),
            pl.BlockSpec((9, HW), lambda n: (0, 0)),
            pl.BlockSpec((planes, Cin), lambda n: (0, 0)),
            pl.BlockSpec((planes, 1), lambda n: (0, 0)),
            pl.BlockSpec((planes, 9 * planes), lambda n: (0, 0)),
            pl.BlockSpec((planes, 1), lambda n: (0, 0)),
            pl.BlockSpec((cout, planes), lambda n: (0, 0)),
            pl.BlockSpec((cout, 1), lambda n: (0, 0)),
        ],
        out_specs=pl.BlockSpec((ips, cout, HW), lambda n: (n, 0, 0)),
        compiler_params=pltpu.CompilerParams(
            dimension_semantics=("parallel",),   # image blocks shard across TCs
        ),
        cost_estimate=pl.CostEstimate(
            flops=flops, transcendentals=0, bytes_accessed=bytes_accessed),
    )(x, mask9, params["w1"], params["b1"], params["w2"], params["b2"],
      params["w3"], params["b3"])
    return out.reshape(N, cout, H, W)


def prepare_params(w1_oihw, bn1, w2_oihw, bn2, w3_oihw, bn3):
    """Fold inference-mode BN into the (bias-free) conv weights, pre-arrange
    them in the layouts the kernel consumes, and cast matmul operands to bf16
    (biases stay f32)."""
    def fold(w_oihw, bn):
        gamma, beta, mean, var = bn
        scale = gamma / jnp.sqrt(var + BN_EPS)
        shift = beta - mean * scale
        return w_oihw * scale[:, None, None, None], shift[:, None]

    w1f, b1 = fold(w1_oihw, bn1)            # (P, Cin, 1, 1), (P, 1)
    w2f, b2 = fold(w2_oihw, bn2)            # (P, P, 3, 3),   (P, 1)
    w3f, b3 = fold(w3_oihw, bn3)            # (4P, P, 1, 1),  (4P, 1)
    P = w1f.shape[0]
    # (O, I, kh, kw) -> (O, kh, kw, I) -> (O, 9I): tap-major / in-channel-minor
    # K ordering, matching the sublane order of the in-kernel patch concat.
    w2_mat = jnp.transpose(w2f, (0, 2, 3, 1)).reshape(P, 9 * P)
    return {
        "w1": w1f[:, :, 0, 0].astype(jnp.bfloat16),       # (P, Cin)
        "b1": b1.astype(jnp.float32),
        "w2": w2_mat.astype(jnp.bfloat16),                # (P, 9P)
        "b2": b2.astype(jnp.float32),
        "w3": w3f[:, :, 0, 0].astype(jnp.bfloat16),       # (4P, P)
        "b3": b3.astype(jnp.float32),
    }


# ---------------------------------------------------------------------------
# Plain-JAX references (for correctness checks)
# ---------------------------------------------------------------------------

def _bn_ref(y, p):
    gamma, beta, mean, var = p
    inv = gamma / jnp.sqrt(var + BN_EPS)
    return (y - mean[None, :, None, None]) * inv[None, :, None, None] \
        + beta[None, :, None, None]


def reference_forward(x_nchw, w1_oihw, bn1, w2_oihw, bn2, w3_oihw, bn3):
    """Exact original-module semantics in f32 (loose check vs bf16 kernel)."""
    dn = ("NCHW", "OIHW", "NCHW")
    o = lax.conv_general_dilated(x_nchw, w1_oihw, (1, 1), "VALID",
                                 dimension_numbers=dn)
    o = jax.nn.relu(_bn_ref(o, bn1))
    o = lax.conv_general_dilated(o, w2_oihw, (1, 1), ((1, 1), (1, 1)),
                                 dimension_numbers=dn)
    o = jax.nn.relu(_bn_ref(o, bn2))
    o = lax.conv_general_dilated(o, w3_oihw, (1, 1), "VALID",
                                 dimension_numbers=dn)
    o = _bn_ref(o, bn3)
    return jax.nn.relu(o + x_nchw)


def reference_quantized(x_nchw, params):
    """Plain-JAX mirror of the kernel's arithmetic (bf16 matmul operands,
    f32 accumulate + epilogue) for a tight numerical cross-check."""
    N, Cin, H, W = x_nchw.shape
    HW = H * W
    P = params["w1"].shape[0]
    x = x_nchw.reshape(N, Cin, HW).astype(jnp.float32)

    o1 = jnp.einsum("pc,ncl->npl", params["w1"], x.astype(jnp.bfloat16),
                    preferred_element_type=jnp.float32)
    o1 = jnp.maximum(o1 + params["b1"][None], 0.0)

    o1_img = o1.reshape(N, P, H, W)
    o1_pad = jnp.pad(o1_img, ((0, 0), (0, 0), (1, 1), (1, 1)))
    taps = [o1_pad[:, :, kh:kh + H, kw:kw + W]
            for kh in range(3) for kw in range(3)]
    patch = jnp.concatenate(taps, axis=1).reshape(N, 9 * P, HW)
    o2 = jnp.einsum("pk,nkl->npl", params["w2"], patch.astype(jnp.bfloat16),
                    preferred_element_type=jnp.float32)
    o2 = jnp.maximum(o2 + params["b2"][None], 0.0)

    o3 = jnp.einsum("op,npl->nol", params["w3"], o2.astype(jnp.bfloat16),
                    preferred_element_type=jnp.float32)
    o3 = o3 + params["b3"][None] + x
    return jnp.maximum(o3, 0.0).reshape(N, -1, H, W)


# ---------------------------------------------------------------------------
# Main
# ---------------------------------------------------------------------------

if __name__ == "__main__":
    key = jax.random.PRNGKey(0)
    N, planes, H, W = 2, 8, 16, 16
    inplanes = planes * 4        # required when downsample is None (residual add)

    ks = jax.random.split(key, 16)
    x = jax.random.normal(ks[0], (N, inplanes, H, W), jnp.float32)

    # PyTorch-style OIHW weights (deterministic synthetic init).
    w1_oihw = jax.random.normal(ks[1], (planes, inplanes, 1, 1), jnp.float32) * 0.1
    w2_oihw = jax.random.normal(ks[2], (planes, planes, 3, 3), jnp.float32) * 0.1
    w3_oihw = jax.random.normal(ks[3], (planes * 4, planes, 1, 1), jnp.float32) * 0.1

    def make_bn(kg, kb, km, kv, C):
        gamma = jax.random.uniform(kg, (C,), jnp.float32, 0.5, 1.5)
        beta = jax.random.normal(kb, (C,), jnp.float32) * 0.1
        mean = jax.random.normal(km, (C,), jnp.float32) * 0.1
        var = jax.random.uniform(kv, (C,), jnp.float32, 0.5, 1.5)
        return (gamma, beta, mean, var)

    bn1 = make_bn(ks[4], ks[5], ks[6], ks[7], planes)
    bn2 = make_bn(ks[8], ks[9], ks[10], ks[11], planes)
    bn3 = make_bn(ks[12], ks[13], ks[14], ks[15], planes * 4)

    params = prepare_params(w1_oihw, bn1, w2_oihw, bn2, w3_oihw, bn3)

    out = bottleneck_forward(x, params)
    out = jax.block_until_ready(out)
    assert out.shape == (N, inplanes, H, W)

    # Tight check: kernel vs a plain-JAX mirror of its bf16/f32 arithmetic.
    ref_q = jax.block_until_ready(reference_quantized(x, params))
    assert jnp.allclose(out, ref_q, atol=1e-3, rtol=1e-3), \
        f"quantized-ref max abs err = {jnp.max(jnp.abs(out - ref_q))}"

    # Semantic check: kernel vs the exact f32 module math (loose tolerance to
    # absorb bf16 matmul-operand quantization).
    ref = jax.block_until_ready(
        reference_forward(x, w1_oihw, bn1, w2_oihw, bn2, w3_oihw, bn3))
    assert jnp.allclose(out, ref, atol=5e-2, rtol=5e-2), \
        f"f32-ref max abs err = {jnp.max(jnp.abs(out - ref))}"

    print("KERNEL_OK")
</pallas_src>

<mosaic_0001>
module attributes {stable_mosaic.version = 11 : i64} {
  func.func @_bottleneck_kernel(%arg0: i32, %arg1: memref<2x32x256xf32, #tpu.memory_space<vmem>>, %arg2: memref<9x256xf32, #tpu.memory_space<vmem>>, %arg3: memref<8x32xbf16, #tpu.memory_space<vmem>>, %arg4: memref<8x1xf32, #tpu.memory_space<vmem>>, %arg5: memref<8x72xbf16, #tpu.memory_space<vmem>>, %arg6: memref<8x1xf32, #tpu.memory_space<vmem>>, %arg7: memref<32x8xbf16, #tpu.memory_space<vmem>>, %arg8: memref<32x1xf32, #tpu.memory_space<vmem>>, %arg9: memref<2x32x256xf32, #tpu.memory_space<vmem>>) attributes {dimension_semantics = [#tpu.dimension_semantics<parallel>], iteration_bounds = array<i64: 1>, scalar_prefetch = 0 : i64, scratch_operands = 0 : i64, tpu.core_type = #tpu.core_type<tc>, window_params = [{transform_indices = @transform_0, window_bounds = array<i64: 2, 32, 256>}, {pipeline_mode = #tpu.pipeline_mode<synchronous>, transform_indices = @transform_1, window_bounds = array<i64: 9, 256>}, {pipeline_mode = #tpu.pipeline_mode<synchronous>, transform_indices = @transform_2, window_bounds = array<i64: 8, 32>}, {pipeline_mode = #tpu.pipeline_mode<synchronous>, transform_indices = @transform_3, window_bounds = array<i64: 8, 1>}, {pipeline_mode = #tpu.pipeline_mode<synchronous>, transform_indices = @transform_4, window_bounds = array<i64: 8, 72>}, {pipeline_mode = #tpu.pipeline_mode<synchronous>, transform_indices = @transform_5, window_bounds = array<i64: 8, 1>}, {pipeline_mode = #tpu.pipeline_mode<synchronous>, transform_indices = @transform_6, window_bounds = array<i64: 32, 8>}, {pipeline_mode = #tpu.pipeline_mode<synchronous>, transform_indices = @transform_7, window_bounds = array<i64: 32, 1>}, {transform_indices = @transform_8, window_bounds = array<i64: 2, 32, 256>}]} {
    %c0 = arith.constant 0 : index
    %c0_0 = arith.constant 0 : index
    %0 = vector.load %arg3[%c0, %c0_0] : memref<8x32xbf16, #tpu.memory_space<vmem>>, vector<8x32xbf16>
    %c0_1 = arith.constant 0 : index
    %c0_2 = arith.constant 0 : index
    %c0_3 = arith.constant 0 : index
    %1 = vector.load %arg1[%c0_1, %c0_2, %c0_3] : memref<2x32x256xf32, #tpu.memory_space<vmem>>, vector<1x32x256xf32>
    %2 = vector.shape_cast %1 : vector<1x32x256xf32> to vector<32x256xf32>
    %3 = arith.truncf %2 : vector<32x256xf32> to vector<32x256xbf16>
    %cst = arith.constant dense<0.000000e+00> : vector<8x256xf32>
    %4 = tpu.matmul %0, %3, %cst {dimension_numbers = #tpu.dot_dimension_numbers<[1], [0], [0], [1], [0, 0, 1, 1], [], []>} : vector<8x32xbf16>, vector<32x256xbf16>, vector<8x256xf32> -> vector<8x256xf32>
    %c0_4 = arith.constant 0 : index
    %c0_5 = arith.constant 0 : index
    %5 = vector.load %arg4[%c0_4, %c0_5] : memref<8x1xf32, #tpu.memory_space<vmem>>, vector<8x1xf32>
    %6 = vector.broadcast %5 : vector<8x1xf32> to vector<8x256xf32>
    %7 = arith.addf %4, %6 : vector<8x256xf32>
    %cst_6 = arith.constant 0.000000e+00 : f32
    %8 = vector.broadcast %cst_6 : f32 to vector<8x256xf32>
    %9 = arith.maximumf %7, %8 : vector<8x256xf32>
    %c17_i32 = arith.constant 17 : i32
    %10 = tpu.dynamic_rotate %9 by %c17_i32 dim 1 : vector<8x256xf32>, i32 -> vector<8x256xf32>
    %c0_7 = arith.constant 0 : index
    %c0_8 = arith.constant 0 : index
    %11 = vector.load %arg2[%c0_7, %c0_8] : memref<9x256xf32, #tpu.memory_space<vmem>>, vector<1x256xf32>
    %12 = vector.broadcast %11 : vector<1x256xf32> to vector<8x256xf32>
    %13 = arith.mulf %10, %12 : vector<8x256xf32>
    %c16_i32 = arith.constant 16 : i32
    %14 = tpu.dynamic_rotate %9 by %c16_i32 dim 1 : vector<8x256xf32>, i32 -> vector<8x256xf32>
    %c1 = arith.constant 1 : index
    %c0_9 = arith.constant 0 : index
    %15 = vector.load %arg2[%c1, %c0_9] : memref<9x256xf32, #tpu.memory_space<vmem>>, vector<1x256xf32>
    %16 = vector.broadcast %15 : vector<1x256xf32> to vector<8x256xf32>
    %17 = arith.mulf %14, %16 : vector<8x256xf32>
    %c15_i32 = arith.constant 15 : i32
    %18 = tpu.dynamic_rotate %9 by %c15_i32 dim 1 : vector<8x256xf32>, i32 -> vector<8x256xf32>
    %c2 = arith.constant 2 : index
    %c0_10 = arith.constant 0 : index
    %19 = vector.load %arg2[%c2, %c0_10] : memref<9x256xf32, #tpu.memory_space<vmem>>, vector<1x256xf32>
    %20 = vector.broadcast %19 : vector<1x256xf32> to vector<8x256xf32>
    %21 = arith.mulf %18, %20 : vector<8x256xf32>
    %c1_i32 = arith.constant 1 : i32
    %22 = tpu.dynamic_rotate %9 by %c1_i32 dim 1 : vector<8x256xf32>, i32 -> vector<8x256xf32>
    %c3 = arith.constant 3 : index
    %c0_11 = arith.constant 0 : index
    %23 = vector.load %arg2[%c3, %c0_11] : memref<9x256xf32, #tpu.memory_space<vmem>>, vector<1x256xf32>
    %24 = vector.broadcast %23 : vector<1x256xf32> to vector<8x256xf32>
    %25 = arith.mulf %22, %24 : vector<8x256xf32>
    %c255_i32 = arith.constant 255 : i32
    %26 = tpu.dynamic_rotate %9 by %c255_i32 dim 1 : vector<8x256xf32>, i32 -> vector<8x256xf32>
    %c5 = arith.constant 5 : index
    %c0_12 = arith.constant 0 : index
    %27 = vector.load %arg2[%c5, %c0_12] : memref<9x256xf32, #tpu.memory_space<vmem>>, vector<1x256xf32>
    %28 = vector.broadcast %27 : vector<1x256xf32> to vector<8x256xf32>
    %29 = arith.mulf %26, %28 : vector<8x256xf32>
    %c241_i32 = arith.constant 241 : i32
    %30 = tpu.dynamic_rotate %9 by %c241_i32 dim 1 : vector<8x256xf32>, i32 -> vector<8x256xf32>
    %c6 = arith.constant 6 : index
    %c0_13 = arith.constant 0 : index
    %31 = vector.load %arg2[%c6, %c0_13] : memref<9x256xf32, #tpu.memory_space<vmem>>, vector<1x256xf32>
    %32 = vector.broadcast %31 : vector<1x256xf32> to vector<8x256xf32>
    %33 = arith.mulf %30, %32 : vector<8x256xf32>
    %c240_i32 = arith.constant 240 : i32
    %34 = tpu.dynamic_rotate %9 by %c240_i32 dim 1 : vector<8x256xf32>, i32 -> vector<8x256xf32>
    %c7 = arith.constant 7 : index
    %c0_14 = arith.constant 0 : index
    %35 = vector.load %arg2[%c7, %c0_14] : memref<9x256xf32, #tpu.memory_space<vmem>>, vector<1x256xf32>
    %36 = vector.broadcast %35 : vector<1x256xf32> to vector<8x256xf32>
    %37 = arith.mulf %34, %36 : vector<8x256xf32>
    %c239_i32 = arith.constant 239 : i32
    %38 = tpu.dynamic_rotate %9 by %c239_i32 dim 1 : vector<8x256xf32>, i32 -> vector<8x256xf32>
    %c8 = arith.constant 8 : index
    %c0_15 = arith.constant 0 : index
    %39 = vector.load %arg2[%c8, %c0_15] : memref<9x256xf32, #tpu.memory_space<vmem>>, vector<1x256xf32>
    %40 = vector.broadcast %39 : vector<1x256xf32> to vector<8x256xf32>
    %41 = arith.mulf %38, %40 : vector<8x256xf32>
    %42 = tpu.concatenate %13, %17, %21, %25, %9, %29, %33, %37, %41 in 0 : vector<8x256xf32>, vector<8x256xf32>, vector<8x256xf32>, vector<8x256xf32>, vector<8x256xf32>, vector<8x256xf32>, vector<8x256xf32>, vector<8x256xf32>, vector<8x256xf32> -> vector<72x256xf32>
    %43 = arith.truncf %42 : vector<72x256xf32> to vector<72x256xbf16>
    %c0_16 = arith.constant 0 : index
    %c0_17 = arith.constant 0 : index
    %44 = vector.load %arg5[%c0_16, %c0_17] : memref<8x72xbf16, #tpu.memory_space<vmem>>, vector<8x72xbf16>
    %cst_18 = arith.constant dense<0.000000e+00> : vector<8x256xf32>
    %45 = tpu.matmul %44, %43, %cst_18 {dimension_numbers = #tpu.dot_dimension_numbers<[1], [0], [0], [1], [0, 0, 1, 1], [], []>} : vector<8x72xbf16>, vector<72x256xbf16>, vector<8x256xf32> -> vector<8x256xf32>
    %c0_19 = arith.constant 0 : index
    %c0_20 = arith.constant 0 : index
    %46 = vector.load %arg6[%c0_19, %c0_20] : memref<8x1xf32, #tpu.memory_space<vmem>>, vector<8x1xf32>
    %47 = vector.broadcast %46 : vector<8x1xf32> to vector<8x256xf32>
    %48 = arith.addf %45, %47 : vector<8x256xf32>
    %cst_21 = arith.constant 0.000000e+00 : f32
    %49 = vector.broadcast %cst_21 : f32 to vector<8x256xf32>
    %50 = arith.maximumf %48, %49 : vector<8x256xf32>
    %c0_22 = arith.constant 0 : index
    %c0_23 = arith.constant 0 : index
    %51 = vector.load %arg7[%c0_22, %c0_23] : memref<32x8xbf16, #tpu.memory_space<vmem>>, vector<32x8xbf16>
    %52 = arith.truncf %50 : vector<8x256xf32> to vector<8x256xbf16>
    %cst_24 = arith.constant dense<0.000000e+00> : vector<32x256xf32>
    %53 = tpu.matmul %51, %52, %cst_24 {dimension_numbers = #tpu.dot_dimension_numbers<[1], [0], [0], [1], [0, 0, 1, 1], [], []>} : vector<32x8xbf16>, vector<8x256xbf16>, vector<32x256xf32> -> vector<32x256xf32>
    %c0_25 = arith.constant 0 : index
    %c0_26 = arith.constant 0 : index
    %54 = vector.load %arg8[%c0_25, %c0_26] : memref<32x1xf32, #tpu.memory_space<vmem>>, vector<32x1xf32>
    %55 = vector.broadcast %54 : vector<32x1xf32> to vector<32x256xf32>
    %56 = arith.addf %53, %55 : vector<32x256xf32>
    %c0_27 = arith.constant 0 : index
    %c0_28 = arith.constant 0 : index
    %c0_29 = arith.constant 0 : index
    %57 = vector.load %arg1[%c0_27, %c0_28, %c0_29] : memref<2x32x256xf32, #tpu.memory_space<vmem>>, vector<1x32x256xf32>
    %58 = vector.shape_cast %57 : vector<1x32x256xf32> to vector<32x256xf32>
    %59 = arith.addf %56, %58 : vector<32x256xf32>
    %cst_30 = arith.constant 0.000000e+00 : f32
    %60 = vector.broadcast %cst_30 : f32 to vector<32x256xf32>
    %61 = arith.maximumf %59, %60 : vector<32x256xf32>
    %c0_31 = arith.constant 0 : index
    %c0_32 = arith.constant 0 : index
    %c0_33 = arith.constant 0 : index
    %62 = vector.load %arg9[%c0_31, %c0_32, %c0_33] : memref<2x32x256xf32, #tpu.memory_space<vmem>>, vector<1x32x256xf32>
    %63 = vector.shape_cast %62 : vector<1x32x256xf32> to vector<32x256xf32>
    %64 = vector.shape_cast %61 : vector<32x256xf32> to vector<1x32x256xf32>
    tpu.vector_store %arg9[%c0_31, %c0_32, %c0_33], %64 {strides = array<i32>} : memref<2x32x256xf32, #tpu.memory_space<vmem>>, vector<1x32x256xf32>,
    %c0_34 = arith.constant 0 : index
    %c0_35 = arith.constant 0 : index
    %65 = vector.load %arg3[%c0_34, %c0_35] : memref<8x32xbf16, #tpu.memory_space<vmem>>, vector<8x32xbf16>
    %c1_36 = arith.constant 1 : index
    %c0_37 = arith.constant 0 : index
    %c0_38 = arith.constant 0 : index
    %66 = vector.load %arg1[%c1_36, %c0_37, %c0_38] : memref<2x32x256xf32, #tpu.memory_space<vmem>>, vector<1x32x256xf32>
    %67 = vector.shape_cast %66 : vector<1x32x256xf32> to vector<32x256xf32>
    %68 = arith.truncf %67 : vector<32x256xf32> to vector<32x256xbf16>
    %cst_39 = arith.constant dense<0.000000e+00> : vector<8x256xf32>
    %69 = tpu.matmul %65, %68, %cst_39 {dimension_numbers = #tpu.dot_dimension_numbers<[1], [0], [0], [1], [0, 0, 1, 1], [], []>} : vector<8x32xbf16>, vector<32x256xbf16>, vector<8x256xf32> -> vector<8x256xf32>
    %c0_40 = arith.constant 0 : index
    %c0_41 = arith.constant 0 : index
    %70 = vector.load %arg4[%c0_40, %c0_41] : memref<8x1xf32, #tpu.memory_space<vmem>>, vector<8x1xf32>
    %71 = vector.broadcast %70 : vector<8x1xf32> to vector<8x256xf32>
    %72 = arith.addf %69, %71 : vector<8x256xf32>
    %cst_42 = arith.constant 0.000000e+00 : f32
    %73 = vector.broadcast %cst_42 : f32 to vector<8x256xf32>
    %74 = arith.maximumf %72, %73 : vector<8x256xf32>
    %c17_i32_43 = arith.constant 17 : i32
    %75 = tpu.dynamic_rotate %74 by %c17_i32_43 dim 1 : vector<8x256xf32>, i32 -> vector<8x256xf32>
    %c0_44 = arith.constant 0 : index
    %c0_45 = arith.constant 0 : index
    %76 = vector.load %arg2[%c0_44, %c0_45] : memref<9x256xf32, #tpu.memory_space<vmem>>, vector<1x256xf32>
    %77 = vector.broadcast %76 : vector<1x256xf32> to vector<8x256xf32>
    %78 = arith.mulf %75, %77 : vector<8x256xf32>
    %c16_i32_46 = arith.constant 16 : i32
    %79 = tpu.dynamic_rotate %74 by %c16_i32_46 dim 1 : vector<8x256xf32>, i32 -> vector<8x256xf32>
    %c1_47 = arith.constant 1 : index
    %c0_48 = arith.constant 0 : index
    %80 = vector.load %arg2[%c1_47, %c0_48] : memref<9x256xf32, #tpu.memory_space<vmem>>, vector<1x256xf32>
    %81 = vector.broadcast %80 : vector<1x256xf32> to vector<8x256xf32>
    %82 = arith.mulf %79, %81 : vector<8x256xf32>
    %c15_i32_49 = arith.constant 15 : i32
    %83 = tpu.dynamic_rotate %74 by %c15_i32_49 dim 1 : vector<8x256xf32>, i32 -> vector<8x256xf32>
    %c2_50 = arith.constant 2 : index
    %c0_51 = arith.constant 0 : index
    %84 = vector.load %arg2[%c2_50, %c0_51] : memref<9x256xf32, #tpu.memory_space<vmem>>, vector<1x256xf32>
    %85 = vector.broadcast %84 : vector<1x256xf32> to vector<8x256xf32>
    %86 = arith.mulf %83, %85 : vector<8x256xf32>
    %c1_i32_52 = arith.constant 1 : i32
    %87 = tpu.dynamic_rotate %74 by %c1_i32_52 dim 1 : vector<8x256xf32>, i32 -> vector<8x256xf32>
    %c3_53 = arith.constant 3 : index
    %c0_54 = arith.constant 0 : index
    %88 = vector.load %arg2[%c3_53, %c0_54] : memref<9x256xf32, #tpu.memory_space<vmem>>, vector<1x256xf32>
    %89 = vector.broadcast %88 : vector<1x256xf32> to vector<8x256xf32>
    %90 = arith.mulf %87, %89 : vector<8x256xf32>
    %c255_i32_55 = arith.constant 255 : i32
    %91 = tpu.dynamic_rotate %74 by %c255_i32_55 dim 1 : vector<8x256xf32>, i32 -> vector<8x256xf32>
    %c5_56 = arith.constant 5 : index
    %c0_57 = arith.constant 0 : index
    %92 = vector.load %arg2[%c5_56, %c0_57] : memref<9x256xf32, #tpu.memory_space<vmem>>, vector<1x256xf32>
    %93 = vector.broadcast %92 : vector<1x256xf32> to vector<8x256xf32>
    %94 = arith.mulf %91, %93 : vector<8x256xf32>
    %c241_i32_58 = arith.constant 241 : i32
    %95 = tpu.dynamic_rotate %74 by %c241_i32_58 dim 1 : vector<8x256xf32>, i32 -> vector<8x256xf32>
    %c6_59 = arith.constant 6 : index
    %c0_60 = arith.constant 0 : index
    %96 = vector.load %arg2[%c6_59, %c0_60] : memref<9x256xf32, #tpu.memory_space<vmem>>, vector<1x256xf32>
    %97 = vector.broadcast %96 : vector<1x256xf32> to vector<8x256xf32>
    %98 = arith.mulf %95, %97 : vector<8x256xf32>
    %c240_i32_61 = arith.constant 240 : i32
    %99 = tpu.dynamic_rotate %74 by %c240_i32_61 dim 1 : vector<8x256xf32>, i32 -> vector<8x256xf32>
    %c7_62 = arith.constant 7 : index
    %c0_63 = arith.constant 0 : index
    %100 = vector.load %arg2[%c7_62, %c0_63] : memref<9x256xf32, #tpu.memory_space<vmem>>, vector<1x256xf32>
    %101 = vector.broadcast %100 : vector<1x256xf32> to vector<8x256xf32>
    %102 = arith.mulf %99, %101 : vector<8x256xf32>
    %c239_i32_64 = arith.constant 239 : i32
    %103 = tpu.dynamic_rotate %74 by %c239_i32_64 dim 1 : vector<8x256xf32>, i32 -> vector<8x256xf32>
    %c8_65 = arith.constant 8 : index
    %c0_66 = arith.constant 0 : index
    %104 = vector.load %arg2[%c8_65, %c0_66] : memref<9x256xf32, #tpu.memory_space<vmem>>, vector<1x256xf32>
    %105 = vector.broadcast %104 : vector<1x256xf32> to vector<8x256xf32>
    %106 = arith.mulf %103, %105 : vector<8x256xf32>
    %107 = tpu.concatenate %78, %82, %86, %90, %74, %94, %98, %102, %106 in 0 : vector<8x256xf32>, vector<8x256xf32>, vector<8x256xf32>, vector<8x256xf32>, vector<8x256xf32>, vector<8x256xf32>, vector<8x256xf32>, vector<8x256xf32>, vector<8x256xf32> -> vector<72x256xf32>
    %108 = arith.truncf %107 : vector<72x256xf32> to vector<72x256xbf16>
    %c0_67 = arith.constant 0 : index
    %c0_68 = arith.constant 0 : index
    %109 = vector.load %arg5[%c0_67, %c0_68] : memref<8x72xbf16, #tpu.memory_space<vmem>>, vector<8x72xbf16>
    %cst_69 = arith.constant dense<0.000000e+00> : vector<8x256xf32>
    %110 = tpu.matmul %109, %108, %cst_69 {dimension_numbers = #tpu.dot_dimension_numbers<[1], [0], [0], [1], [0, 0, 1, 1], [], []>} : vector<8x72xbf16>, vector<72x256xbf16>, vector<8x256xf32> -> vector<8x256xf32>
    %c0_70 = arith.constant 0 : index
    %c0_71 = arith.constant 0 : index
    %111 = vector.load %arg6[%c0_70, %c0_71] : memref<8x1xf32, #tpu.memory_space<vmem>>, vector<8x1xf32>
    %112 = vector.broadcast %111 : vector<8x1xf32> to vector<8x256xf32>
    %113 = arith.addf %110, %112 : vector<8x256xf32>
    %cst_72 = arith.constant 0.000000e+00 : f32
    %114 = vector.broadcast %cst_72 : f32 to vector<8x256xf32>
    %115 = arith.maximumf %113, %114 : vector<8x256xf32>
    %c0_73 = arith.constant 0 : index
    %c0_74 = arith.constant 0 : index
    %116 = vector.load %arg7[%c0_73, %c0_74] : memref<32x8xbf16, #tpu.memory_space<vmem>>, vector<32x8xbf16>
    %117 = arith.truncf %115 : vector<8x256xf32> to vector<8x256xbf16>
    %cst_75 = arith.constant dense<0.000000e+00> : vector<32x256xf32>
    %118 = tpu.matmul %116, %117, %cst_75 {dimension_numbers = #tpu.dot_dimension_numbers<[1], [0], [0], [1], [0, 0, 1, 1], [], []>} : vector<32x8xbf16>, vector<8x256xbf16>, vector<32x256xf32> -> vector<32x256xf32>
    %c0_76 = arith.constant 0 : index
    %c0_77 = arith.constant 0 : index
    %119 = vector.load %arg8[%c0_76, %c0_77] : memref<32x1xf32, #tpu.memory_space<vmem>>, vector<32x1xf32>
    %120 = vector.broadcast %119 : vector<32x1xf32> to vector<32x256xf32>
    %121 = arith.addf %118, %120 : vector<32x256xf32>
    %c1_78 = arith.constant 1 : index
    %c0_79 = arith.constant 0 : index
    %c0_80 = arith.constant 0 : index
    %122 = vector.load %arg1[%c1_78, %c0_79, %c0_80] : memref<2x32x256xf32, #tpu.memory_space<vmem>>, vector<1x32x256xf32>
    %123 = vector.shape_cast %122 : vector<1x32x256xf32> to vector<32x256xf32>
    %124 = arith.addf %121, %123 : vector<32x256xf32>
    %cst_81 = arith.constant 0.000000e+00 : f32
    %125 = vector.broadcast %cst_81 : f32 to vector<32x256xf32>
    %126 = arith.maximumf %124, %125 : vector<32x256xf32>
    %c1_82 = arith.constant 1 : index
    %c0_83 = arith.constant 0 : index
    %c0_84 = arith.constant 0 : index
    %127 = vector.load %arg9[%c1_82, %c0_83, %c0_84] : memref<2x32x256xf32, #tpu.memory_space<vmem>>, vector<1x32x256xf32>
    %128 = vector.shape_cast %127 : vector<1x32x256xf32> to vector<32x256xf32>
    %129 = vector.shape_cast %126 : vector<32x256xf32> to vector<1x32x256xf32>
    tpu.vector_store %arg9[%c1_82, %c0_83, %c0_84], %129 {strides = array<i32>} : memref<2x32x256xf32, #tpu.memory_space<vmem>>, vector<1x32x256xf32>,
    return
  }
  func.func @transform_0(%arg0: i32) -> (i32, i32, i32) {
    %c0_i32 = arith.constant 0 : i32
    %c0_i32_0 = arith.constant 0 : i32
    %c0_i32_1 = arith.constant 0 : i32
    return %arg0, %c0_i32, %c0_i32_0 : i32, i32, i32
  }
  func.func @transform_1(%arg0: i32) -> (i32, i32) {
    %c0_i32 = arith.constant 0 : i32
    %c0_i32_0 = arith.constant 0 : i32
    %c0_i32_1 = arith.constant 0 : i32
    return %c0_i32, %c0_i32_0 : i32, i32
  }
  func.func @transform_2(%arg0: i32) -> (i32, i32) {
    %c0_i32 = arith.constant 0 : i32
    %c0_i32_0 = arith.constant 0 : i32
    %c0_i32_1 = arith.constant 0 : i32
    return %c0_i32, %c0_i32_0 : i32, i32
  }
  func.func @transform_3(%arg0: i32) -> (i32, i32) {
    %c0_i32 = arith.constant 0 : i32
    %c0_i32_0 = arith.constant 0 : i32
    %c0_i32_1 = arith.constant 0 : i32
    return %c0_i32, %c0_i32_0 : i32, i32
  }
  func.func @transform_4(%arg0: i32) -> (i32, i32) {
    %c0_i32 = arith.constant 0 : i32
    %c0_i32_0 = arith.constant 0 : i32
    %c0_i32_1 = arith.constant 0 : i32
    return %c0_i32, %c0_i32_0 : i32, i32
  }
  func.func @transform_5(%arg0: i32) -> (i32, i32) {
    %c0_i32 = arith.constant 0 : i32
    %c0_i32_0 = arith.constant 0 : i32
    %c0_i32_1 = arith.constant 0 : i32
    return %c0_i32, %c0_i32_0 : i32, i32
  }
  func.func @transform_6(%arg0: i32) -> (i32, i32) {
    %c0_i32 = arith.constant 0 : i32
    %c0_i32_0 = arith.constant 0 : i32
    %c0_i32_1 = arith.constant 0 : i32
    return %c0_i32, %c0_i32_0 : i32, i32
  }
  func.func @transform_7(%arg0: i32) -> (i32, i32) {
    %c0_i32 = arith.constant 0 : i32
    %c0_i32_0 = arith.constant 0 : i32
    %c0_i32_1 = arith.constant 0 : i32
    return %c0_i32, %c0_i32_0 : i32, i32
  }
  func.func @transform_8(%arg0: i32) -> (i32, i32, i32) {
    %c0_i32 = arith.constant 0 : i32
    %c0_i32_0 = arith.constant 0 : i32
    %c0_i32_1 = arith.constant 0 : i32
    return %arg0, %c0_i32, %c0_i32_0 : i32, i32, i32
  }
}

</mosaic_0001>

<bundles_post_ra>
// kernel: bottleneck_forward.1
= control target key start
LH: loop header
LB: loop body
LE: loop exit
PB: predicated region body
PF: predicated region fallthrough
CT: control target
= control target key end

     0   :  { %v964_v3 = vmov 0   ;;  %vm49_vm0 = vcmask 261120   ;;  %s966_s25 = smov 17   ;;  %s967_s26 = smov 15   ;;  %v100_v25 = vlaneseq  ;;  %vm294_vm9 = vcmask 1043456   ;;  %s1484_s0 = inlined_call_operand.vmem [shape: f32[2,32,256], index: 0, kind: input, shape index: {}]   ;;  %s1485_s3 = inlined_call_operand.vmem [shape: f32[8,1], index: 3, kind: input, shape index: {}]   ;;  %s1486_s2 = inlined_call_operand.vmem [shape: bf16[8,32], index: 2, kind: input, shape index: {}]   ;;  %s1487_s5 = inlined_call_operand.vmem [shape: f32[8,1], index: 5, kind: input, shape index: {}]   ;;  %s1488_s1 = inlined_call_operand.vmem [shape: f32[9,256], index: 1, kind: input, shape index: {}]   ;;  %s1489_s4 = inlined_call_operand.vmem [shape: bf16[8,72], index: 4, kind: input, shape index: {}]   ;;  %s1490_s6 = inlined_call_operand.vmem [shape: bf16[32,8], index: 6, kind: input, shape index: {}]   ;;  %s1491_s7 = inlined_call_operand.vmem [shape: f32[32,1], index: 7, kind: input, shape index: {}]   ;;  %s1492_s8 = inlined_call_operand.vmem [shape: f32[2,32,256], index: 8, kind: output, shape index: {}]  }
   0x1   :  { %v1021_v0 = vld [vmem:[%s1484_s0 + $0x8] sm:$0xff]  ;;  %v1026_v1 = vld [vmem:[%s1484_s0 + $0x18] sm:$0xff]  ;;  %v1031_v2 = vld [vmem:[%s1484_s0] sm:$0xff]  ;;  %85 = vmatprep.mubr.bf16.mxu0 %v964_v3  ;;  %958 = vset.pattern.permute.xlu0 %v964_v3  ;;  %s968_s27 = smov 1   ;;  %s969_s28 = smov 127   ;;  %vm290_vm10 = vcmask 588800  }
   0x2   :  { %v40_v4 = vpack.c.bf16 %v1026_v1, %v1021_v0  ;;  %v1040_v5 = vld [vmem:[%s1484_s0 + $0x10] sm:$0xff]  ;;  %v1045_v6 = vld [vmem:[%s1484_s0 + $0x28] sm:$0xff]  ;;  %v1050_v7 = vld [vmem:[%s1484_s0 + $0x38] sm:$0xff]  ;;  %333 = vmatprep.mubr.bf16.mxu1 %v964_v3  ;;  %959 = vset.pattern.permute.xlu1 %v964_v3  ;;  %s970_s29 = smov 113   ;;  %s971_s30 = smov 112   ;;  %v108_v28 = vshrl.u32 %v100_v25, 7 }
   0x3   :  { %v39_v8 = vpack.c.bf16 %v1040_v5, %v1031_v2  ;;  %v42_v9 = vpack.c.bf16 %v1050_v7, %v1045_v6  ;;  %v1061_v10 = vld [vmem:[%s1484_s0 + $0x20] sm:$0xff]  ;;  %v1066_v11 = vld [vmem:[%s1484_s0 + $0x30] sm:$0xff]  ;;  %s972_s9 = smov 111   ;;  %v1120_v29 = vand.u32 127, %v100_v25  ;;  %vm384_vm11 = vcmask 64512  }
   0x4   :  { %53 = vmatprep.subr.bf16.mxu0 %v40_v4  ;;  %v43_v12 = vld [vmem:[%s1485_s3] sm:$0xff]  ;;  %v41_v13 = vpack.c.bf16 %v1066_v11, %v1061_v10  ;;  %s965_s3 = smov 16   ;;  %v1122_v31 = vsub.s32 0, %v108_v28  ;;  %v1124_v32 = vsub.s32 1, %v108_v28 }
   0x5   :  { %54 = vmatpush1.bf16.msra.mxu0 %v39_v8  ;;  %46 = vperm.xlu0 %958, %v43_v12   ;;  %v30_v14 = vld [vmem:[%s1486_s2] sm:$0xf]  ;;  %vm123_vm1 = vcmp.lt.s32.totalorder %v1120_v29, 16  ;;  %vm145_vm2 = vcmp.lt.s32.totalorder %v1120_v29, 15  ;;  %vm102_vm3 = vcmp.lt.s32.totalorder %v1120_v29, 17  ;;  %vm167_vm4 = vcmp.lt.s32.totalorder %v1120_v29, 1 }
   0x6   :  { %55 = vmatprep.subr.bf16.mxu0 %v42_v9  ;;  %v1117_v24 = vld [vmem:[%s1487_s5] sm:$0xff]  ;;  %vm189_vm5 = vcmp.lt.s32.totalorder %v1120_v29, 127  ;;  %vm211_vm6 = vcmp.lt.s32.totalorder %v1120_v29, 113  ;;  %vm233_vm7 = vcmp.lt.s32.totalorder %v1120_v29, 112  ;;  %vm255_vm8 = vcmp.lt.s32.totalorder %v1120_v29, 111 }
   0x7   :  { %v904_v34 = vld [vmem:[%s1488_s1 + $0x1] ss:$8 sm:$0x3]  ;;  %v105_v35 = vld [vmem:[%s1488_s1] ss:$8 sm:$0x3] }
   0x8   :  { %v906_v36 = vld [vmem:[%s1488_s1 + $0x3] ss:$8 sm:$0x3]  ;;  %v132_v37 = vrot.slane %v904_v34, %v1122_v31  ;;  %v905_v39 = vld [vmem:[%s1488_s1 + $0x2] ss:$8 sm:$0x3]  ;;  %v136_v41 = vrot.slane %v904_v34, %v1124_v32  ;;  %v110_v45 = vrot.slane %v105_v35, %v1122_v31  ;;  %v114_v47 = vrot.slane %v105_v35, %v1124_v32 }
   0x9   :  { %56 = vmatpush1.bf16.msra.mxu0 %v41_v13  ;;  %v907_v44 = vld [vmem:[%s1488_s1 + $0x5] ss:$8 sm:$0x3]  ;;  %v180_v46 = vrot.slane %v906_v36, %v1124_v32  ;;  %v158_v48 = vrot.slane %v905_v39, %v1124_v32  ;;  %v176_v49 = vrot.slane %v906_v36, %v1122_v31  ;;  %v154_v63 = vrot.slane %v905_v39, %v1122_v31  ;;  %v910_v36 = vld [vmem:[%s1488_s1 + $0x10] ss:$8 sm:$0x3] }
   0xa   :  { %v202_v53 = vrot.slane %v907_v44, %v1124_v32 }
   0xc   :  { %903 = vmatmul.mubr.msk.bf16.vlgmr.msra.gmra.mrb[0].mxu0 %vm49_vm0, %v30_v14 }
   0xd   :  { %429 = vmatprep.mubr.bf16.mxu0 %v964_v3 }
  0x84   :  { %v47_v15 = vpop.permute.xlu0 %46 }
  0xdf   :  { %v87_v16 = vpop.f32.mrb[0].mxu0 }
  0xe0   :  { %v88_v17 = vadd.f32 %v87_v16, %v47_v15  ;;  %v89_v18 = vpop.f32.mrb[1].mxu0  ;;  %v198_v16 = vrot.slane %v907_v44, %v1122_v31 }
  0xe1   :  { %v91_v19 = vpop.f32.mrb[2].mxu0  ;;  %v90_v21 = vadd.f32 %v89_v18, %v47_v15 }
  0xe2   :  { %v1078_v20 = vmax.f32 %v88_v17, 0.0  ;;  %v92_v22 = vpop.f32.mrb[3].mxu0 }
  0xe3   :  { %v1084_v23 = vmax.f32 %v90_v21, 0.0  ;;  %v908_v22 = vld [vmem:[%s1488_s1 + $0x6] ss:$8 sm:$0x3] }
  0xe4   :  { %119 = vrot.lane.b32.xlu1 %v1078_v20, %s965_s3  ;;  %96 = vrot.lane.b32.xlu0 %v1078_v20, %s966_s25  ;;  %v224_v34 = vrot.slane %v908_v22, %v1124_v32 }
  0xe8   :  { %141 = vrot.lane.b32.xlu1 %v1078_v20, %s967_s26  ;;  %121 = vrot.lane.b32.xlu0 %v1084_v23, %s965_s3 }
  0xec   :  { %163 = vrot.lane.b32.xlu1 %v1078_v20, %s968_s27  ;;  %143 = vrot.lane.b32.xlu0 %v1084_v23, %s967_s26 }
  0xf0   :  { %98 = vrot.lane.b32.xlu1 %v1084_v23, %s966_s25  ;;  %165 = vrot.lane.b32.xlu0 %v1084_v23, %s968_s27 }
  0xf4   :  { %185 = vrot.lane.b32.xlu1 %v1078_v20, %s969_s28  ;;  %187 = vrot.lane.b32.xlu0 %v1084_v23, %s969_s28 }
  0xf8   :  { %207 = vrot.lane.b32.xlu1 %v1078_v20, %s970_s29  ;;  %209 = vrot.lane.b32.xlu0 %v1084_v23, %s970_s29 }
  0xfc   :  { %229 = vrot.lane.b32.xlu1 %v1078_v20, %s971_s30  ;;  %231 = vrot.lane.b32.xlu0 %v1084_v23, %s971_s30 }
 0x100   :  { %251 = vrot.lane.b32.xlu1 %v1078_v20, %s972_s9  ;;  %253 = vrot.lane.b32.xlu0 %v1084_v23, %s972_s9 }
 0x104   :  { %287 = vperm.xlu0 %958, %v1117_v24   ;;  %491 = vperm.xlu1 %959, %v43_v12  }
 0x156   :  { %v120_v26 = vpop.permute.xlu1 %119  ;;  %v97_v27 = vpop.permute.xlu0 %96 }
 0x15a   :  { %v142_v30 = vpop.permute.xlu1 %141  ;;  %v122_v33 = vpop.permute.xlu0 %121 }
 0x15b   :  { %v124_v42 = vsel %vm123_vm1, %v120_v26, %v122_v33  ;;  %v125_v43 = vsel %vm123_vm1, %v122_v33, %v120_v26  ;;  %v909_v26 = vld [vmem:[%s1488_s1 + $0x7] ss:$8 sm:$0x3]  ;;  %v220_v33 = vrot.slane %v908_v22, %v1122_v31 }
 0x15c   :  { %v139_v50 = vmul.f32 %v132_v37, %v125_v43  ;;  %v140_v54 = vmul.f32 %v136_v41, %v124_v42  ;;  %v246_v39 = vrot.slane %v909_v26, %v1124_v32 }
 0x15e   :  { %v164_v38 = vpop.permute.xlu1 %163  ;;  %v144_v40 = vpop.permute.xlu0 %143 }
 0x15f   :  { %v146_v55 = vsel %vm145_vm2, %v142_v30, %v144_v40  ;;  %v147_v4 = vsel %vm145_vm2, %v144_v40, %v142_v30 }
 0x160   :  { %v162_v8 = vmul.f32 %v158_v48, %v146_v55  ;;  %v161_v25 = vmul.f32 %v154_v63, %v147_v4  ;;  %v1223_v4 = vld [vmem:[%s1484_s0 + $0x40] sm:$0xff] }
 0x162   :  { %v99_v51 = vpop.permute.xlu1 %98  ;;  %v166_v52 = vpop.permute.xlu0 %165 }
 0x163   :  { %v103_v56 = vsel %vm102_vm3, %v97_v27, %v99_v51  ;;  %v104_v57 = vsel %vm102_vm3, %v99_v51, %v97_v27  ;;  %v168_v58 = vsel %vm167_vm4, %v164_v38, %v166_v52  ;;  %v169_v60 = vsel %vm167_vm4, %v166_v52, %v164_v38 }
 0x164   :  { %v117_v59 = vmul.f32 %v110_v45, %v104_v57  ;;  %v184_v61 = vmul.f32 %v180_v46, %v168_v58  ;;  %v118_v62 = vmul.f32 %v114_v47, %v103_v56  ;;  %v183_v15 = vmul.f32 %v176_v49, %v169_v60  ;;  %v1216_v58 = vld [vmem:[%s1484_s0 + $0x58] sm:$0xff] }
 0x165   :  { %v242_v38 = vrot.slane %v909_v26, %v1122_v31  ;;  %v268_v47 = vrot.slane %v910_v36, %v1124_v32 }
 0x166   :  { %v186_v9 = vpop.permute.xlu1 %185  ;;  %v188_v12 = vpop.permute.xlu0 %187  ;;  %v274_v13 = vpack.c.bf16 %v140_v54, %v118_v62  ;;  %v273_v14 = vpack.c.bf16 %v139_v50, %v117_v59  ;;  %v276_v21 = vpack.c.bf16 %v184_v61, %v162_v8  ;;  %v275_v35 = vpack.c.bf16 %v183_v15, %v161_v25  ;;  %v1228_v8 = vld [vmem:[%s1484_s0 + $0x50] sm:$0xff] }
 0x167   :  { %v191_v17 = vsel %vm189_vm5, %v188_v12, %v186_v9  ;;  %v190_v18 = vsel %vm189_vm5, %v186_v9, %v188_v12  ;;  %v1233_v9 = vld [vmem:[%s1484_s0 + $0x68] sm:$0xff]  ;;  %v1238_v12 = vld [vmem:[%s1484_s0 + $0x78] sm:$0xff]  ;;  %v484_v15 = vpack.c.bf16 %v1228_v8, %v1223_v4 }
 0x168   :  { %v206_v19 = vmul.f32 %v202_v53, %v191_v17  ;;  %301 = vmatprep.subr.bf16.mxu1 %v274_v13  ;;  %v205_v30 = vmul.f32 %v198_v16, %v190_v18  ;;  %v487_v16 = vpack.c.bf16 %v1238_v12, %v1233_v9  ;;  %v1252_v17 = vld [vmem:[%s1484_s0 + $0x60] sm:$0xff]  ;;  %v1257_v18 = vld [vmem:[%s1484_s0 + $0x70] sm:$0xff] }
 0x169   :  { %302 = vmatpush1.bf16.msra.mxu1 %v273_v14  ;;  %v283_v14 = vld [vmem:[%s1489_s4] sm:$0xf] }
 0x16a   :  { %v208_v27 = vpop.permute.xlu1 %207  ;;  %303 = vmatprep.subr.bf16.mxu1 %v276_v21  ;;  %v210_v28 = vpop.permute.xlu0 %209  ;;  %v278_v37 = vpack.c.bf16 %v206_v19, %v1084_v23  ;;  %v264_v23 = vrot.slane %v910_v36, %v1122_v31  ;;  %v277_v46 = vpack.c.bf16 %v205_v30, %v1078_v20  ;;  %v1211_v20 = vld [vmem:[%s1484_s0 + $0x48] sm:$0xff]  ;;  %v486_v19 = vpack.c.bf16 %v1257_v18, %v1252_v17  ;;  %v474_v21 = vld [vmem:[%s1486_s2] sm:$0xf] }
 0x16b   :  { %v212_v40 = vsel %vm211_vm6, %v208_v27, %v210_v28  ;;  %v213_v41 = vsel %vm211_vm6, %v210_v28, %v208_v27  ;;  %v485_v63 = vpack.c.bf16 %v1216_v58, %v1211_v20 }
 0x16c   :  { %v227_v48 = vmul.f32 %v220_v33, %v212_v40  ;;  %v228_v49 = vmul.f32 %v224_v34, %v213_v41  ;;  %v960_v41 = vld [vmem:[%s1490_s6] sm:$0xff]  }
 0x16d   :  { %304 = vmatpush1.bf16.msra.mxu1 %v275_v35 }
 0x16e   :  { %v230_v42 = vpop.permute.xlu1 %229  ;;  %305 = vmatprep.subr.bf16.mxu1 %v278_v37  ;;  %v232_v43 = vpop.permute.xlu0 %231 }
 0x16f   :  { %v234_v44 = vsel %vm233_vm7, %v230_v42, %v232_v43  ;;  %v235_v45 = vsel %vm233_vm7, %v232_v43, %v230_v42 }
 0x170   :  { %v249_v50 = vmul.f32 %v242_v38, %v234_v44  ;;  %v250_v51 = vmul.f32 %v246_v39, %v235_v45 }
 0x171   :  { %306 = vmatpush1.bf16.msra.mxu1 %v277_v46 }
 0x172   :  { %v252_v52 = vpop.permute.xlu1 %251  ;;  %v254_v53 = vpop.permute.xlu0 %253  ;;  %v280_v54 = vpack.c.bf16 %v250_v51, %v228_v49  ;;  %v279_v55 = vpack.c.bf16 %v249_v50, %v227_v48  ;;  %v961_v48 = vld [vmem:[%s1490_s6 + $0x8] sm:$0xff]   ;;  %v350_v49 = vld [vmem:[%s1491_s7] sm:$0xff]  ;;  %v352_v51 = vld [vmem:[%s1491_s7 + $0x10] sm:$0xff] }
 0x173   :  { %v256_v56 = vsel %vm255_vm8, %v252_v52, %v254_v53  ;;  %v257_v57 = vsel %vm255_vm8, %v254_v53, %v252_v52  ;;  %v351_v50 = vld [vmem:[%s1491_s7 + $0x8] sm:$0xff]  ;;  %v353_v52 = vld [vmem:[%s1491_s7 + $0x18] sm:$0xff] }
 0x174   :  { %v271_v59 = vmul.f32 %v264_v23, %v256_v56  ;;  %v272_v60 = vmul.f32 %v268_v47, %v257_v57  ;;  %307 = vmatprep.subr.bf16.mxu1 %v280_v54  ;;  %v546_v53 = vld [vmem:[%s1488_s1] ss:$8 sm:$0x3]  ;;  %v927_v54 = vld [vmem:[%s1488_s1 + $0x1] ss:$8 sm:$0x3] }
 0x175   :  { %308 = vmatpush1.bf16.msra.mxu1 %v279_v55  ;;  %v551_v56 = vrot.slane %v546_v53, %v1122_v31  ;;  %v555_v57 = vrot.slane %v546_v53, %v1124_v32 }
 0x176   :  { %v281_v61 = vpack.c.bf16 %v271_v59, %v271_v59  ;;  %v282_v62 = vpack.c.bf16 %v272_v60, %v272_v60  ;;  %v571_v59 = vrot.slane %v927_v54, %v1122_v31  ;;  %v575_v60 = vrot.slane %v927_v54, %v1124_v32 }
 0x178   :  { %911 = vmatprep.subr.msk.bf16.mxu1 %vm294_vm9, %v282_v62  ;;  %v296_v13 = vsel %vm294_vm9, %v281_v61, 0 }
 0x179   :  { %310 = vmatpush1.bf16.msra.mxu1 %v296_v13 }
 0x17a   :  { %497 = vmatprep.subr.bf16.mxu1 %v485_v63 }
 0x17c   :  { %912 = vmatmul.mubr.msk.bf16.vlgmr.msra.gmra.mrb[0].mxu1 %vm290_vm10, %v283_v14 }
 0x17d   :  { %498 = vmatpush1.bf16.msra.mxu1 %v484_v15  ;;  %529 = vmatprep.mubr.bf16.mxu1 %v964_v3 }
 0x17e   :  { %499 = vmatprep.subr.bf16.mxu1 %v487_v16 }
 0x181   :  { %500 = vmatpush1.bf16.msra.mxu1 %v486_v19 }
 0x183   :  { %v288_v22 = vpop.permute.xlu0 %287  ;;  %v492_v38 = vpop.permute.xlu1 %491 }
 0x184   :  { %926 = vmatmul.mubr.msk.bf16.vlgmr.msra.gmra.mrb[4].mxu1 %vm49_vm0, %v474_v21 }
 0x185   :  { %853 = vmatprep.mubr.bf16.mxu1 %v964_v3 }
 0x24f   :  { %v335_v25 = vpop.f32.mrb[0].mxu1 }
 0x250   :  { %v336_v26 = vadd.f32 %v335_v25, %v288_v22  ;;  %v337_v27 = vpop.f32.mrb[1].mxu1 }
 0x251   :  { %v338_v28 = vadd.f32 %v337_v27, %v288_v22  ;;  %v339_v30 = vpop.f32.mrb[2].mxu1  ;;  %v929_v27 = vld [vmem:[%s1488_s1 + $0x3] ss:$8 sm:$0x3] }
 0x252   :  { %v342_v33 = vmax.f32 %v336_v26, 0.0  ;;  %v340_v34 = vpop.f32.mrb[3].mxu1  ;;  %v928_v26 = vld [vmem:[%s1488_s1 + $0x2] ss:$8 sm:$0x3] }
 0x253   :  { %v343_v35 = vmax.f32 %v338_v28, 0.0  ;;  %v591_v34 = vrot.slane %v928_v26, %v1122_v31 }
 0x254   :  { %v348_v36 = vpack.c.bf16 %v342_v33, %v342_v33 }
 0x255   :  { %v349_v37 = vpack.c.bf16 %v343_v35, %v343_v35  ;;  %v595_v35 = vrot.slane %v928_v26, %v1124_v32 }
 0x256   :  { %v392_v39 = vsel %vm294_vm9, %v348_v36, 0  ;;  %v611_v36 = vrot.slane %v929_v27, %v1122_v31 }
 0x257   :  { %915 = vmatprep.subr.msk.bf16.mxu0 %vm294_vm9, %v349_v37  ;;  %v531_v40 = vpop.f32.mrb[4].mxu1  ;;  %v615_v37 = vrot.slane %v929_v27, %v1124_v32 }
 0x258   :  { %v532_v42 = vadd.f32 %v531_v40, %v492_v38  ;;  %398 = vmatpush1.bf16.msra.mxu0 %v392_v39  ;;  %v533_v43 = vpop.f32.mrb[5].mxu1 }
 0x259   :  { %v534_v23 = vadd.f32 %v533_v43, %v492_v38  ;;  %v535_v44 = vpop.f32.mrb[6].mxu1  ;;  %v930_v38 = vld [vmem:[%s1488_s1 + $0x5] ss:$8 sm:$0x3] }
 0x25a   :  { %v1273_v45 = vmax.f32 %v532_v42, 0.0  ;;  %v536_v46 = vpop.f32.mrb[7].mxu1  ;;  %v631_v44 = vrot.slane %v930_v38, %v1122_v31 }
 0x25b   :  { %v1275_v47 = vmax.f32 %v534_v23, 0.0  ;;  %916 = vmatmul.mubr.msk.bf16.vlgmr.msra.gmra.mrb[4].mxu0 %vm384_vm11, %v960_v41  ;;  %v635_v46 = vrot.slane %v930_v38, %v1124_v32 }
 0x25c   :  { %540 = vrot.lane.b32.xlu1 %v1273_v45, %s966_s25  ;;  %439 = vmatprep.mubr.bf16.mxu0 %v964_v3 }
 0x25d   :  { %542 = vrot.lane.b32.xlu0 %v1275_v47, %s966_s25 }
 0x260   :  { %560 = vrot.lane.b32.xlu1 %v1273_v45, %s965_s3 }
 0x261   :  { %562 = vrot.lane.b32.xlu0 %v1275_v47, %s965_s3 }
 0x263   :  { %917 = vmatmul.mubr.msk.bf16.gmra.mrb[8].mxu0 %vm384_vm11, %v961_v48 }
 0x264   :  { %580 = vrot.lane.b32.xlu1 %v1273_v45, %s967_s26  ;;  %758 = vmatprep.mubr.bf16.mxu0 %v964_v3 }
 0x265   :  { %582 = vrot.lane.b32.xlu0 %v1275_v47, %s967_s26 }
 0x268   :  { %600 = vrot.lane.b32.xlu1 %v1273_v45, %s968_s27 }
 0x269   :  { %602 = vrot.lane.b32.xlu0 %v1275_v47, %s968_s27 }
 0x26c   :  { %620 = vrot.lane.b32.xlu1 %v1273_v45, %s969_s28 }
 0x26d   :  { %622 = vrot.lane.b32.xlu0 %v1275_v47, %s969_s28 }
 0x270   :  { %640 = vrot.lane.b32.xlu1 %v1273_v45, %s970_s29 }
 0x271   :  { %642 = vrot.lane.b32.xlu0 %v1275_v47, %s970_s29 }
 0x274   :  { %660 = vrot.lane.b32.xlu1 %v1273_v45, %s971_s30 }
 0x275   :  { %662 = vrot.lane.b32.xlu0 %v1275_v47, %s971_s30 }
 0x278   :  { %680 = vrot.lane.b32.xlu1 %v1273_v45, %s972_s9 }
 0x279   :  { %682 = vrot.lane.b32.xlu0 %v1275_v47, %s972_s9 }
 0x27c   :  { %714 = vperm.xlu1 %959, %v1117_v24  }
 0x27d   :  { %356 = vperm.xlu0 %958, %v350_v49  }
 0x280   :  { %361 = vperm.xlu1 %959, %v351_v50  }
 0x281   :  { %366 = vperm.xlu0 %958, %v352_v51  }
 0x284   :  { %371 = vperm.xlu1 %959, %v353_v52  }
 0x285   :  { %781 = vperm.xlu0 %958, %v350_v49  }
 0x288   :  { %786 = vperm.xlu1 %959, %v351_v50  }
 0x289   :  { %791 = vperm.xlu0 %958, %v352_v51  }
 0x28c   :  { %796 = vperm.xlu1 %959, %v353_v52  }
 0x2ce   :  { %v541_v24 = vpop.permute.xlu1 %540 }
 0x2cf   :  { %v543_v55 = vpop.permute.xlu0 %542 }
 0x2d0   :  { %v544_v61 = vsel %vm102_vm3, %v541_v24, %v543_v55  ;;  %v545_v62 = vsel %vm102_vm3, %v543_v55, %v541_v24 }
 0x2d1   :  { %v558_v16 = vmul.f32 %v551_v56, %v545_v62  ;;  %v559_v19 = vmul.f32 %v555_v57, %v544_v61  ;;  %v931_v61 = vld [vmem:[%s1488_s1 + $0x6] ss:$8 sm:$0x3]  ;;  %v932_v62 = vld [vmem:[%s1488_s1 + $0x7] ss:$8 sm:$0x3] }
 0x2d2   :  { %v561_v63 = vpop.permute.xlu1 %560 }
 0x2d3   :  { %v563_v13 = vpop.permute.xlu0 %562 }
 0x2d4   :  { %v564_v14 = vsel %vm123_vm1, %v561_v63, %v563_v13  ;;  %v565_v15 = vsel %vm123_vm1, %v563_v13, %v561_v63 }
 0x2d5   :  { %v578_v21 = vmul.f32 %v571_v59, %v565_v15  ;;  %v579_v22 = vmul.f32 %v575_v60, %v564_v14  ;;  %v651_v15 = vrot.slane %v931_v61, %v1122_v31 }
 0x2d6   :  { %v581_v25 = vpop.permute.xlu1 %580 }
 0x2d7   :  { %v700_v28 = vpack.c.bf16 %v578_v21, %v558_v16  ;;  %v583_v30 = vpop.permute.xlu0 %582  ;;  %v701_v33 = vpack.c.bf16 %v579_v22, %v559_v19  ;;  %v655_v16 = vrot.slane %v931_v61, %v1124_v32  ;;  %v671_v19 = vrot.slane %v932_v62, %v1122_v31  ;;  %v933_v22 = vld [vmem:[%s1488_s1 + $0x10] ss:$8 sm:$0x3] }
 0x2d8   :  { %v584_v39 = vsel %vm145_vm2, %v581_v25, %v583_v30  ;;  %v585_v40 = vsel %vm145_vm2, %v583_v30, %v581_v25  ;;  %v675_v21 = vrot.slane %v932_v62, %v1124_v32  ;;  %v691_v30 = vrot.slane %v933_v22, %v1122_v31 }
 0x2d9   :  { %726 = vmatprep.subr.bf16.mxu0 %v701_v33  ;;  %v598_v48 = vmul.f32 %v591_v34, %v585_v40  ;;  %v599_v49 = vmul.f32 %v595_v35, %v584_v39  ;;  %v695_v33 = vrot.slane %v933_v22, %v1124_v32 }
 0x2da   :  { %v601_v41 = vpop.permute.xlu1 %600  ;;  %727 = vmatpush1.bf16.msra.mxu0 %v700_v28 }
 0x2db   :  { %v603_v42 = vpop.permute.xlu0 %602 }
 0x2dc   :  { %v604_v43 = vsel %vm167_vm4, %v601_v41, %v603_v42  ;;  %v605_v23 = vsel %vm167_vm4, %v603_v42, %v601_v41 }
 0x2dd   :  { %v618_v50 = vmul.f32 %v611_v36, %v605_v23  ;;  %v619_v51 = vmul.f32 %v615_v37, %v604_v43 }
 0x2de   :  { %v621_v52 = vpop.permute.xlu1 %620 }
 0x2df   :  { %v702_v24 = vpack.c.bf16 %v618_v50, %v598_v48  ;;  %v623_v53 = vpop.permute.xlu0 %622  ;;  %v703_v54 = vpack.c.bf16 %v619_v51, %v599_v49  ;;  %v710_v48 = vld [vmem:[%s1489_s4] sm:$0xf] }
 0x2e0   :  { %v624_v55 = vsel %vm189_vm5, %v621_v52, %v623_v53  ;;  %v625_v56 = vsel %vm189_vm5, %v623_v53, %v621_v52 }
 0x2e1   :  { %v638_v57 = vmul.f32 %v631_v44, %v624_v55  ;;  %v639_v59 = vmul.f32 %v635_v46, %v625_v56  ;;  %728 = vmatprep.subr.bf16.mxu0 %v703_v54 }
 0x2e2   :  { %v641_v60 = vpop.permute.xlu1 %640  ;;  %729 = vmatpush1.bf16.msra.mxu0 %v702_v24 }
 0x2e3   :  { %v704_v63 = vpack.c.bf16 %v638_v57, %v1273_v45  ;;  %v643_v13 = vpop.permute.xlu0 %642  ;;  %v705_v14 = vpack.c.bf16 %v639_v59, %v1275_v47 }
 0x2e4   :  { %v644_v25 = vsel %vm211_vm6, %v641_v60, %v643_v13  ;;  %v645_v45 = vsel %vm211_vm6, %v643_v13, %v641_v60 }
 0x2e5   :  { %730 = vmatprep.subr.bf16.mxu0 %v705_v14  ;;  %v658_v34 = vmul.f32 %v651_v15, %v644_v25  ;;  %v659_v35 = vmul.f32 %v655_v16, %v645_v45 }
 0x2e6   :  { %v661_v47 = vpop.permute.xlu1 %660  ;;  %731 = vmatpush1.bf16.msra.mxu0 %v704_v63 }
 0x2e7   :  { %v663_v26 = vpop.permute.xlu0 %662 }
 0x2e8   :  { %v664_v27 = vsel %vm233_vm7, %v661_v47, %v663_v26  ;;  %v665_v28 = vsel %vm233_vm7, %v663_v26, %v661_v47 }
 0x2e9   :  { %v678_v36 = vmul.f32 %v671_v19, %v664_v27  ;;  %v679_v37 = vmul.f32 %v675_v21, %v665_v28 }
 0x2ea   :  { %v681_v38 = vpop.permute.xlu1 %680 }
 0x2eb   :  { %v706_v39 = vpack.c.bf16 %v678_v36, %v658_v34  ;;  %v683_v40 = vpop.permute.xlu0 %682  ;;  %v707_v41 = vpack.c.bf16 %v679_v37, %v659_v35 }
 0x2ec   :  { %v684_v42 = vsel %vm255_vm8, %v681_v38, %v683_v40  ;;  %v685_v43 = vsel %vm255_vm8, %v683_v40, %v681_v38 }
 0x2ed   :  { %v698_v23 = vmul.f32 %v691_v30, %v684_v42  ;;  %v699_v44 = vmul.f32 %v695_v33, %v685_v43  ;;  %732 = vmatprep.subr.bf16.mxu0 %v707_v41  ;;  %v962_v43 = vld [vmem:[%s1490_s6] sm:$0xff]  }
 0x2ee   :  { %733 = vmatpush1.bf16.msra.mxu0 %v706_v39 }
 0x2ef   :  { %v708_v31 = vpack.c.bf16 %v698_v23, %v698_v23  ;;  %v709_v32 = vpack.c.bf16 %v699_v44, %v699_v44  ;;  %v963_v23 = vld [vmem:[%s1490_s6 + $0x8] sm:$0xff]  }
 0x2f1   :  { %934 = vmatprep.subr.msk.bf16.mxu0 %vm294_vm9, %v709_v32  ;;  %v721_v46 = vsel %vm294_vm9, %v708_v31, 0 }
 0x2f2   :  { %735 = vmatpush1.bf16.msra.mxu0 %v721_v46 }
 0x2f5   :  { %935 = vmatmul.mubr.msk.bf16.vlgmr.msra.gmra.mrb[12].mxu0 %vm290_vm10, %v710_v48 }
 0x2fb   :  { %v715_v49 = vpop.permute.xlu1 %714 }
 0x2fc   :  { %v357_v29 = vpop.permute.xlu0 %356 }
 0x2ff   :  { %v362_v24 = vpop.permute.xlu1 %361 }
 0x300   :  { %v367_v15 = vpop.permute.xlu0 %366 }
 0x303   :  { %v372_v19 = vpop.permute.xlu1 %371 }
 0x304   :  { %v782_v44 = vpop.permute.xlu0 %781 }
 0x307   :  { %v787_v48 = vpop.permute.xlu1 %786 }
 0x32e   :  { %v431_v50 = vpop.f32.mrb[4].mxu0 }
 0x32f   :  { %v432_v51 = vadd.f32 %v431_v50, %v357_v29  ;;  %v433_v52 = vpop.f32.mrb[5].mxu0 }
 0x330   :  { %v434_v53 = vadd.f32 %v433_v52, %v357_v29  ;;  %v435_v54 = vpop.f32.mrb[6].mxu0 }
 0x331   :  { %v450_v55 = vadd.f32 %v432_v51, %v1031_v2  ;;  %v436_v56 = vadd.f32 %v435_v54, %v362_v24  ;;  %v437_v57 = vpop.f32.mrb[7].mxu0 }
 0x332   :  { %v451_v59 = vadd.f32 %v434_v53, %v1021_v0  ;;  %v438_v60 = vadd.f32 %v437_v57, %v362_v24 }
 0x333   :  { %v458_v61 = vmax.f32 %v450_v55, 0.0  ;;  %v452_v62 = vadd.f32 %v436_v56, %v1040_v5 }
 0x334   :  { %v459_v63 = vmax.f32 %v451_v59, 0.0  ;;  %v453_v13 = vadd.f32 %v438_v60, %v1026_v1  ;;  %v792_v59 = vpop.permute.xlu0 %791 }
 0x335   :  { %466 = vst [vmem:[%s1492_s8] sm:$0xff] %v458_v61  ;;  %v460_v14 = vmax.f32 %v452_v62, 0.0  ;;  %v797_v61 = vpop.permute.xlu1 %796 }
 0x336   :  { %467 = vst [vmem:[%s1492_s8 + $0x8] sm:$0xff] %v459_v63  ;;  %v461_v2 = vmax.f32 %v453_v13, 0.0  ;;  %v441_v16 = vpop.f32.mrb[8].mxu0 }
 0x337   :  { %468 = vst [vmem:[%s1492_s8 + $0x10] sm:$0xff] %v460_v14  ;;  %v442_v0 = vadd.f32 %v441_v16, %v367_v15  ;;  %v443_v5 = vpop.f32.mrb[9].mxu0 }
 0x338   :  { %469 = vst [vmem:[%s1492_s8 + $0x18] sm:$0xff] %v461_v2  ;;  %v444_v1 = vadd.f32 %v443_v5, %v367_v15  ;;  %v445_v21 = vpop.f32.mrb[10].mxu0 }
 0x339   :  { %v454_v22 = vadd.f32 %v442_v0, %v1061_v10  ;;  %v446_v25 = vadd.f32 %v445_v21, %v372_v19  ;;  %v447_v45 = vpop.f32.mrb[11].mxu0 }
 0x33a   :  { %v455_v47 = vadd.f32 %v444_v1, %v1045_v6  ;;  %v448_v26 = vadd.f32 %v447_v45, %v372_v19 }
 0x33b   :  { %v462_v27 = vmax.f32 %v454_v22, 0.0  ;;  %v456_v28 = vadd.f32 %v446_v25, %v1066_v11 }
 0x33c   :  { %v463_v30 = vmax.f32 %v455_v47, 0.0  ;;  %v457_v33 = vadd.f32 %v448_v26, %v1050_v7 }
 0x33d   :  { %470 = vst [vmem:[%s1492_s8 + $0x20] sm:$0xff] %v462_v27  ;;  %v464_v34 = vmax.f32 %v456_v28, 0.0 }
 0x33e   :  { %471 = vst [vmem:[%s1492_s8 + $0x28] sm:$0xff] %v463_v30  ;;  %v465_v10 = vmax.f32 %v457_v33, 0.0 }
 0x33f   :  { %472 = vst [vmem:[%s1492_s8 + $0x30] sm:$0xff] %v464_v34 }
 0x340   :  { %473 = vst [vmem:[%s1492_s8 + $0x38] sm:$0xff] %v465_v10 }
 0x3c8   :  { %v760_v6 = vpop.f32.mrb[12].mxu0 }
 0x3c9   :  { %v761_v7 = vadd.f32 %v760_v6, %v715_v49  ;;  %v762_v11 = vpop.f32.mrb[13].mxu0 }
 0x3ca   :  { %v763_v35 = vadd.f32 %v762_v11, %v715_v49  ;;  %v764_v36 = vpop.f32.mrb[14].mxu0 }
 0x3cb   :  { %v767_v37 = vmax.f32 %v761_v7, 0.0  ;;  %v765_v38 = vpop.f32.mrb[15].mxu0 }
 0x3cc   :  { %v768_v39 = vmax.f32 %v763_v35, 0.0 }
 0x3cd   :  { %v773_v40 = vpack.c.bf16 %v767_v37, %v767_v37 }
 0x3ce   :  { %v774_v41 = vpack.c.bf16 %v768_v39, %v768_v39 }
 0x3cf   :  { %v816_v42 = vsel %vm294_vm9, %v773_v40, 0 }
 0x3d0   :  { %938 = vmatprep.subr.msk.bf16.mxu1 %vm294_vm9, %v774_v41 }
 0x3d1   :  { %822 = vmatpush1.bf16.msra.mxu1 %v816_v42 }
 0x3d4   :  { %939 = vmatmul.mubr.msk.bf16.vlgmr.msra.gmra.mrb[8].mxu1 %vm384_vm11, %v962_v43 }
 0x3d5   :  { %863 = vmatprep.mubr.bf16.mxu1 %v964_v3 }
 0x3dc   :  { %940 = vmatmul.mubr.msk.bf16.gmra.mrb[12].mxu1 %vm384_vm11, %v963_v23 }
 0x4a7   :  { %v855_v31 = vpop.f32.mrb[8].mxu1 }
 0x4a8   :  { %v856_v32 = vadd.f32 %v855_v31, %v782_v44  ;;  %v857_v46 = vpop.f32.mrb[9].mxu1 }
 0x4a9   :  { %v858_v49 = vadd.f32 %v857_v46, %v782_v44  ;;  %v859_v29 = vpop.f32.mrb[10].mxu1 }
 0x4aa   :  { %v874_v50 = vadd.f32 %v1223_v4, %v856_v32  ;;  %v860_v51 = vadd.f32 %v859_v29, %v787_v48  ;;  %v861_v52 = vpop.f32.mrb[11].mxu1 }
 0x4ab   :  { %v875_v24 = vadd.f32 %v1211_v20, %v858_v49  ;;  %v862_v3 = vadd.f32 %v861_v52, %v787_v48 }
 0x4ac   :  { %v882_v53 = vmax.f32 %v874_v50, 0.0  ;;  %v876_v54 = vadd.f32 %v1228_v8, %v860_v51 }
 0x4ad   :  { %v883_v55 = vmax.f32 %v875_v24, 0.0  ;;  %v877_v56 = vadd.f32 %v1216_v58, %v862_v3 }
 0x4ae   :  { %941 = vst [vmem:[%s1492_s8 + $0x40] sm:$0xff] %v882_v53  ;;  %v884_v57 = vmax.f32 %v876_v54, 0.0 }
 0x4af   :  { %942 = vst [vmem:[%s1492_s8 + $0x48] sm:$0xff] %v883_v55  ;;  %v885_v4 = vmax.f32 %v877_v56, 0.0  ;;  %v865_v60 = vpop.f32.mrb[12].mxu1 }
 0x4b0   :  { %943 = vst [vmem:[%s1492_s8 + $0x50] sm:$0xff] %v884_v57  ;;  %v866_v20 = vadd.f32 %v865_v60, %v792_v59  ;;  %v867_v8 = vpop.f32.mrb[13].mxu1 }
 0x4b1   :  { %944 = vst [vmem:[%s1492_s8 + $0x58] sm:$0xff] %v885_v4  ;;  %v868_v58 = vadd.f32 %v867_v8, %v792_v59  ;;  %v869_v62 = vpop.f32.mrb[14].mxu1 }
 0x4b2   :  { %v878_v63 = vadd.f32 %v1252_v17, %v866_v20  ;;  %v870_v13 = vadd.f32 %v869_v62, %v797_v61  ;;  %v871_v14 = vpop.f32.mrb[15].mxu1 }
 0x4b3   :  { %v879_v15 = vadd.f32 %v1233_v9, %v868_v58  ;;  %v872_v2 = vadd.f32 %v871_v14, %v797_v61 }
 0x4b4   :  { %v886_v16 = vmax.f32 %v878_v63, 0.0  ;;  %v880_v0 = vadd.f32 %v1257_v18, %v870_v13 }
 0x4b5   :  { %v887_v5 = vmax.f32 %v879_v15, 0.0  ;;  %v881_v19 = vadd.f32 %v1238_v12, %v872_v2 }
 0x4b6   :  { %945 = vst [vmem:[%s1492_s8 + $0x60] sm:$0xff] %v886_v16  ;;  %v888_v1 = vmax.f32 %v880_v0, 0.0 }
 0x4b7   :  { %946 = vst [vmem:[%s1492_s8 + $0x68] sm:$0xff] %v887_v5  ;;  %v889_v17 = vmax.f32 %v881_v19, 0.0 }
 0x4b8   :  { %947 = vst [vmem:[%s1492_s8 + $0x70] sm:$0xff] %v888_v1 }
 0x4b9   :  { %948 = vst [vmem:[%s1492_s8 + $0x78] sm:$0xff] %v889_v17 }

</bundles_post_ra>
